<compile_context>
chip_gen: v7x
topology: tpu7x:2x2x1
jax: 0.10.0
libtpu: 0.0.40
codegen_flags: <defaults>
</compile_context>

<pallas_src>
import functools

import jax
import jax.numpy as jnp
from jax.experimental import pallas as pl
from jax.experimental.pallas import tpu as pltpu

_LANE = 128
_SUBLANE = {4: 8, 2: 16, 1: 32}          # dtype-aware sublane alignment
_BUDGET_BYTES = 8 * 1024 * 1024          # per input buffer (2x double-buffered)
_VMEM_LIMIT = 32 * 1024 * 1024


def _select_tiles(R, S, itemsize, tile_rows=None, tile_cols=None):
    """Pick (TR, TS) by byte budget, with lane/sublane alignment."""
    sub = _SUBLANE.get(itemsize, 8)
    target = max(_BUDGET_BYTES // itemsize, sub * _LANE)   # elements per tile

    # --- S (lane / reduction) tile ---------------------------------------
    if tile_cols is not None:
        TS = int(tile_cols)
    elif S * sub <= target:
        TS = S                               # whole reduction extent per block
    else:
        TS = target // sub                   # stream S with minimal row tile
    if TS >= S:
        TS = S                               # full extent: always legal
    else:
        TS = max(_LANE, (TS // _LANE) * _LANE)

    # --- R (sublane / parallel) tile --------------------------------------
    if tile_rows is not None:
        TR = int(tile_rows)
    else:
        # Keep >= 2 row blocks when possible so the "parallel" axis can shard
        # across v7x's two TensorCores.
        tr_cap = max(sub, ((R // 2) // sub) * sub) if R >= 2 * sub else R
        tr_budget = max(sub, ((target // max(TS, 1)) // sub) * sub)
        TR = min(tr_cap, tr_budget)
    if TR >= R:
        TR = R                               # full extent: always legal
    else:
        TR = max(sub, (TR // sub) * sub)

    return TR, TS


def _make_single_step_kernel(inv_s):
    """TS == S: one block holds the full reduction extent for its rows."""

    def kernel(x_ref, o_ref):
        x = x_ref[...].astype(jnp.float32)
        o_ref[...] = (jnp.sum(x, axis=-1, keepdims=True) * inv_s).astype(o_ref.dtype)

    return kernel


def _make_streaming_kernel(inv_s, n_groups, tail_valid):
    """TS < S: resident (TR, 128) f32 partial-sum accumulator over the S axis.

    tail_valid: number of valid lanes in the last S tile (static Python int),
    or None when S divides evenly by TS.
    """

    def _accumulate(x_ref, acc_ref, valid):
        partial = None
        for g in range(n_groups):
            lo = g * _LANE
            if valid is not None and lo >= valid:
                break                        # fully-padded lane group: skip
            v = x_ref[:, lo:lo + _LANE].astype(jnp.float32)
            if valid is not None and (valid - lo) < _LANE:
                col = jax.lax.broadcasted_iota(jnp.int32, v.shape, 1)
                v = jnp.where(col < (valid - lo), v, 0.0)
            partial = v if partial is None else partial + v
        acc_ref[...] += partial

    def kernel(x_ref, o_ref, acc_ref):
        s_idx = pl.program_id(1)
        last = pl.num_programs(1) - 1

        @pl.when(s_idx == 0)
        def _():
            acc_ref[...] = jnp.zeros_like(acc_ref)

        if tail_valid is None:
            _accumulate(x_ref, acc_ref, None)
        else:
            # Pay the mask only on the tail step.
            @pl.when(s_idx < last)
            def _():
                _accumulate(x_ref, acc_ref, None)

            @pl.when(s_idx == last)
            def _():
                _accumulate(x_ref, acc_ref, tail_valid)

        @pl.when(s_idx == last)
        def _():
            total = jnp.sum(acc_ref[...], axis=-1, keepdims=True)  # one XLU reduce
            o_ref[...] = (total * inv_s).astype(o_ref.dtype)

    return kernel


@functools.partial(jax.jit, static_argnames=("tile_rows", "tile_cols"))
def avg_pool(x, *, tile_rows=None, tile_cols=None):
    """Equivalent of AvgPool.forward: mean over all dims after (B, C)."""
    B, C = int(x.shape[0]), int(x.shape[1])
    S = 1
    for d in x.shape[2:]:
        S *= int(d)
    S = max(S, 1)
    R = B * C
    x2 = x.reshape(R, S)                     # contiguous view; no data movement

    itemsize = jnp.dtype(x.dtype).itemsize
    TR, TS = _select_tiles(R, S, itemsize, tile_rows, tile_cols)
    inv_s = 1.0 / float(S)

    if TS >= S:
        # Single S step per row block: no accumulator needed.
        out = pl.pallas_call(
            _make_single_step_kernel(inv_s),
            out_shape=jax.ShapeDtypeStruct((R, 1), x.dtype),
            grid_spec=pltpu.PrefetchScalarGridSpec(
                num_scalar_prefetch=0,
                grid=(pl.cdiv(R, TR),),
                in_specs=[pl.BlockSpec((TR, S), lambda r: (r, 0))],
                out_specs=pl.BlockSpec((TR, 1), lambda r: (r, 0)),
            ),
            compiler_params=pltpu.CompilerParams(
                dimension_semantics=("parallel",),
                vmem_limit_bytes=_VMEM_LIMIT,
            ),
        )(x2)
    else:
        grid_s = pl.cdiv(S, TS)
        tail_valid = (S - (grid_s - 1) * TS) if (S % TS != 0) else None
        out = pl.pallas_call(
            _make_streaming_kernel(inv_s, TS // _LANE, tail_valid),
            out_shape=jax.ShapeDtypeStruct((R, 1), x.dtype),
            grid_spec=pltpu.PrefetchScalarGridSpec(
                num_scalar_prefetch=0,
                grid=(pl.cdiv(R, TR), grid_s),
                in_specs=[pl.BlockSpec((TR, TS), lambda r, s: (r, s))],
                out_specs=pl.BlockSpec((TR, 1), lambda r, s: (r, 0)),
                scratch_shapes=[pltpu.VMEM((TR, _LANE), jnp.float32)],
            ),
            compiler_params=pltpu.CompilerParams(
                dimension_semantics=("parallel", "arbitrary"),
                vmem_limit_bytes=_VMEM_LIMIT,
            ),
        )(x2)

    return out.reshape(B, C)


if __name__ == "__main__":
    key = jax.random.PRNGKey(0)

    # 1) Small NCHW input on the auto-tiled (single S step) path.
    x = jax.random.normal(key, (2, 4, 16, 16), dtype=jnp.float32)
    out = jax.block_until_ready(avg_pool(x))
    ref = jnp.mean(x.reshape(x.shape[0], x.shape[1], -1), axis=2)
    assert out.shape == (2, 4)
    assert jnp.allclose(out, ref, atol=1e-5, rtol=1e-5)

    # 2) Streamed S reduction + tail-only mask (forced tiny S tile): S=300, TS=128.
    key2 = jax.random.PRNGKey(1)
    x2 = jax.random.normal(key2, (2, 3, 10, 30), dtype=jnp.float32)
    out2 = jax.block_until_ready(avg_pool(x2, tile_cols=128))
    ref2 = jnp.mean(x2.reshape(x2.shape[0], x2.shape[1], -1), axis=2)
    assert out2.shape == (2, 3)
    assert jnp.allclose(out2, ref2, atol=1e-5, rtol=1e-5)

    # 3) Multi-lane-group accumulate + skipped fully-padded tail group (TS=256).
    out2b = jax.block_until_ready(avg_pool(x2, tile_cols=256))
    assert jnp.allclose(out2b, ref2, atol=1e-5, rtol=1e-5)

    # 4) Partial row blocks (R=12, TR=8) combined with streamed S + tail mask.
    key3 = jax.random.PRNGKey(2)
    x3 = jax.random.normal(key3, (3, 4, 10, 30), dtype=jnp.float32)
    out3 = jax.block_until_ready(avg_pool(x3, tile_rows=8, tile_cols=128))
    ref3 = jnp.mean(x3.reshape(x3.shape[0], x3.shape[1], -1), axis=2)
    assert out3.shape == (3, 4)
    assert jnp.allclose(out3, ref3, atol=1e-5, rtol=1e-5)

    # 5) bf16 input exercises dtype-aware sublane alignment and the f32 accumulate.
    key4 = jax.random.PRNGKey(3)
    x4 = jax.random.normal(key4, (2, 4, 8, 16), dtype=jnp.bfloat16)
    out4 = jax.block_until_ready(avg_pool(x4))
    ref4 = jnp.mean(x4.astype(jnp.float32).reshape(2, 4, -1), axis=2)
    assert out4.shape == (2, 4)
    assert jnp.allclose(out4.astype(jnp.float32), ref4, atol=1e-2, rtol=1e-2)

    print("KERNEL_OK")
</pallas_src>

<mosaic_0001>
module attributes {stable_mosaic.version = 11 : i64} {
  func.func @kernel(%arg0: i32, %arg1: memref<8x256xf32, #tpu.memory_space<vmem>>, %arg2: memref<8x1xf32, #tpu.memory_space<vmem>>) attributes {dimension_semantics = [#tpu.dimension_semantics<parallel>], iteration_bounds = array<i64: 1>, scalar_prefetch = 0 : i64, scratch_operands = 0 : i64, tpu.core_type = #tpu.core_type<tc>, window_params = [{transform_indices = @transform_0, window_bounds = array<i64: 8, 256>}, {transform_indices = @transform_1, window_bounds = array<i64: 8, 1>}]} {
    %c0 = arith.constant 0 : index
    %c0_0 = arith.constant 0 : index
    %0 = vector.load %arg1[%c0, %c0_0] : memref<8x256xf32, #tpu.memory_space<vmem>>, vector<8x256xf32>
    %cst = arith.constant dense<0.000000e+00> : vector<8xf32>
    %1 = vector.multi_reduction <add>, %0, %cst [1] : vector<8x256xf32> to vector<8xf32>
    %2 = vector.shape_cast %1 : vector<8xf32> to vector<8x1xf32>
    %cst_1 = arith.constant 3.906250e-03 : f32
    %3 = vector.broadcast %cst_1 : f32 to vector<8x1xf32>
    %4 = arith.mulf %2, %3 : vector<8x1xf32>
    %c0_2 = arith.constant 0 : index
    %c0_3 = arith.constant 0 : index
    %5 = vector.load %arg2[%c0_2, %c0_3] : memref<8x1xf32, #tpu.memory_space<vmem>>, vector<8x1xf32>
    tpu.vector_store %arg2[%c0_2, %c0_3], %4 {strides = array<i32>} : memref<8x1xf32, #tpu.memory_space<vmem>>, vector<8x1xf32>,
    return
  }
  func.func @transform_0(%arg0: i32) -> (i32, i32) {
    %c0_i32 = arith.constant 0 : i32
    %c0_i32_0 = arith.constant 0 : i32
    return %arg0, %c0_i32 : i32, i32
  }
  func.func @transform_1(%arg0: i32) -> (i32, i32) {
    %c0_i32 = arith.constant 0 : i32
    %c0_i32_0 = arith.constant 0 : i32
    return %arg0, %c0_i32 : i32, i32
  }
}

</mosaic_0001>

<bundles_post_ra>
// kernel: avg_pool.1
= control target key start
LH: loop header
LB: loop body
LE: loop exit
PB: predicated region body
PF: predicated region fallthrough
CT: control target
= control target key end

     0   :  { %vm14_vm0 = vcmask 7168   ;;  %s39_s0 = inlined_call_operand.vmem [shape: f32[8,256], index: 0, kind: input, shape index: {}]   ;;  %s40_s1 = inlined_call_operand.vmem [shape: f32[8,1], index: 1, kind: output, shape index: {}]  }
   0x1   :  { %v8_v0 = vld [vmem:[%s39_s0] sm:$0xff]  ;;  %v9_v1 = vld [vmem:[%s39_s0 + $0x8] sm:$0xff] }
   0x2   :  { %v10_v2 = vadd.f32 %v9_v1, %v8_v0 }
   0x4   :  { %11 = vadd.xlane.f32.xlu0 %v10_v2 }
  0x91   :  { %v12_v3 = vpop.xlane.xlu0 %11 }
  0x92   :  { %v13_v4 = vmul.f32 0.00390625, %v12_v3 }
  0x94   :  { %15 = vst.msk [vmem:[%s40_s1] sm:$0xff] %vm14_vm0, %v13_v4 }

</bundles_post_ra>
